<compile_context>
chip_gen: v6e
topology: v6e:2x2x1
jax: 0.10.0
libtpu: 0.0.40
codegen_flags: <defaults>
</compile_context>

<pallas_src>
import functools

import jax
import jax.numpy as jnp
from jax import lax
from jax.experimental import pallas as pl
from jax.experimental.pallas import tpu as pltpu


def _round_up(x, m):
    return ((x + m - 1) // m) * m


def _inference_kernel(x_ref, w_ref, b_ref, out_ref, sum_ref, sq_ref, *,
                      real_b, tile_b, inv_b):
    """Two-pass fused forward.

    grid = (2, num_batch_tiles); axis 0: 0 = accumulate BN stats, 1 = normalize.
    x_ref   : [TB, PAD]      bf16  (zero-padded batch rows / feature cols)
    w_ref   : [3, PAD, PAD]  bf16  (w0 | w1 | [wmu|wsig]), zero-padded
    b_ref   : [3, PAD]       f32   (b0 | b1 | [bmu|bsig]), zero-padded
    out_ref : [TB, PAD]      f32   (batch-normed [mu | log_sigma], padded)
    sum_ref, sq_ref : [1, PAD] f32 VMEM scratch (per-feature sum / sum-of-sq)
    """
    p = pl.program_id(0)     # pass index
    j = pl.program_id(1)     # batch-tile index

    @pl.when(jnp.logical_and(p == 0, j == 0))
    def _():
        sum_ref[...] = jnp.zeros_like(sum_ref)
        sq_ref[...] = jnp.zeros_like(sq_ref)

    # --- fused MLP on full padded slabs (bf16 MXU, f32 accumulation) --------
    x = x_ref[...]                                     # bf16 [TB, PAD]
    b = b_ref[...]                                     # f32  [3, PAD]

    h = jnp.dot(x, w_ref[0], preferred_element_type=jnp.float32) + b[0:1]
    h = jnp.tanh(h)
    h = jnp.dot(h.astype(jnp.bfloat16), w_ref[1],
                preferred_element_type=jnp.float32) + b[1:2]
    h = jnp.tanh(h)
    # dropout_enc: identity (eval semantics, deterministic)
    z = jnp.dot(h.astype(jnp.bfloat16), w_ref[2],
                preferred_element_type=jnp.float32) + b[2:3]

    # Row-validity mask: padded batch rows must not pollute the BN statistics.
    row = lax.broadcasted_iota(jnp.int32, (tile_b, 1), 0) + j * tile_b
    valid = (row < real_b).astype(jnp.float32)          # [TB, 1]

    @pl.when(p == 0)
    def _():
        zm = z * valid
        sum_ref[...] += jnp.sum(zm, axis=0, keepdims=True)
        sq_ref[...] += jnp.sum(zm * z, axis=0, keepdims=True)

    @pl.when(p == 1)
    def _():
        # BatchNorm1d(affine=False), training-mode batch stats, biased variance.
        m = sum_ref[...] * inv_b
        v = jnp.maximum(sq_ref[...] * inv_b - m * m, 0.0)   # clamp cancellation
        out_ref[...] = ((z - m) * lax.rsqrt(v + jnp.float32(1e-5))
                        ).astype(out_ref.dtype)


def make_inference_network_forward(input_size, hidden_sizes, output_size):
    """Builds a jitted forward(x, w_all, b_all) -> (mu, log_sigma)."""
    assert len(hidden_sizes) == 2, "kernel is specialized for two hidden sizes"
    h0, h1 = hidden_sizes
    out2 = 2 * output_size
    PAD = _round_up(max(input_size, h0, h1, out2), 128)   # square padded slabs

    @jax.jit
    def forward(x, w_all, b_all):
        B = x.shape[0]
        # Batch padding / tiling (all static under jit).
        b_pad16 = _round_up(B, 16)
        TB = min(b_pad16, 512)
        B_pad = _round_up(b_pad16, TB)
        nbt = B_pad // TB

        # bf16 + lane-padded input: halves the x DMA, keeps every vreg full.
        x_pad = jnp.zeros((B_pad, PAD), jnp.bfloat16)
        x_pad = x_pad.at[:B, :input_size].set(x.astype(jnp.bfloat16))

        # VMEM budget from the actual buffers (weights resident + 2x double-
        # buffered x/out tiles + scratch + generous intermediate headroom).
        est = (3 * PAD * PAD * 2 + 3 * PAD * 4
               + 2 * TB * PAD * 2 + 2 * TB * PAD * 4
               + 2 * 8 * PAD * 4 + 8 * TB * PAD * 4)
        vmem_limit = int(min(max(2 * est, 4 * 2**20), 96 * 2**20))

        kernel = functools.partial(_inference_kernel, real_b=B, tile_b=TB,
                                   inv_b=1.0 / B)

        combined = pl.pallas_call(
            kernel,
            out_shape=jax.ShapeDtypeStruct((B_pad, PAD), jnp.float32),
            grid_spec=pltpu.PrefetchScalarGridSpec(
                num_scalar_prefetch=0,
                grid=(2, nbt),
                in_specs=[
                    pl.BlockSpec((TB, PAD), lambda p, j: (j, 0)),      # x tile
                    pl.BlockSpec((3, PAD, PAD), lambda p, j: (0, 0, 0)),  # weights
                    pl.BlockSpec((3, PAD), lambda p, j: (0, 0)),       # biases
                ],
                # Output stays parked on block 0 during pass 0 (never written),
                # then walks the batch tiles during pass 1.
                out_specs=pl.BlockSpec((TB, PAD), lambda p, j: (j * p, 0)),
                scratch_shapes=[pltpu.VMEM((1, PAD), jnp.float32),
                                pltpu.VMEM((1, PAD), jnp.float32)]),
            compiler_params=pltpu.CompilerParams(
                dimension_semantics=("arbitrary", "arbitrary"),
                vmem_limit_bytes=vmem_limit),
        )(x_pad, w_all, b_all)

        return (combined[:B, :output_size],
                combined[:B, output_size:out2])

    return forward


def init_params(key, input_size, hidden_sizes, output_size):
    """Deterministic synthetic parameters.

    PyTorch Linear stores weight as [out, in]; here they are built directly in
    kernel layout [in, out]. Everything is packed into two kernel operands:
      w_all: [3, PAD, PAD] bf16   (w0 | w1 | [wmu|wsig]), zero-padded to 128
      b_all: [3, PAD]      f32    (b0 | b1 | [bmu|bsig]), zero-padded to 128
    Unpacked f32 copies are kept for the pure-JAX reference.
    """
    assert len(hidden_sizes) == 2, "kernel is specialized for two hidden sizes"
    h0, h1 = hidden_sizes
    PAD = _round_up(max(input_size, h0, h1, 2 * output_size), 128)
    ks = jax.random.split(key, 8)

    def lin(kw, kb, fan_in, fan_out):
        bound = 1.0 / (fan_in ** 0.5)
        w = jax.random.uniform(kw, (fan_in, fan_out), jnp.float32, -bound, bound)
        b = jax.random.uniform(kb, (1, fan_out), jnp.float32, -bound, bound)
        return w, b

    w0, b0 = lin(ks[0], ks[1], input_size, h0)
    w1, b1 = lin(ks[2], ks[3], h0, h1)
    wmu, bmu = lin(ks[4], ks[5], h1, output_size)
    wsig, bsig = lin(ks[6], ks[7], h1, output_size)

    # Fused head: [wmu | wsig] -> single [h1, 2*out] matmul (same for bias).
    whead = jnp.concatenate([wmu, wsig], axis=1)
    bhead = jnp.concatenate([bmu, bsig], axis=1)

    def pad_w(w):
        return jnp.zeros((PAD, PAD), jnp.float32).at[
            :w.shape[0], :w.shape[1]].set(w)

    def pad_b(b):
        return jnp.zeros((PAD,), jnp.float32).at[:b.shape[1]].set(b[0])

    w_all = jnp.stack([pad_w(w0), pad_w(w1), pad_w(whead)]).astype(jnp.bfloat16)
    b_all = jnp.stack([pad_b(b0), pad_b(b1), pad_b(bhead)])

    return dict(
        # packed, kernel-ready operands
        w_all=w_all, b_all=b_all,
        # unpacked f32 copies for the reference
        w0=w0, b0=b0, w1=w1, b1=b1, wmu=wmu, bmu=bmu, wsig=wsig, bsig=bsig)


def reference_forward(x, params):
    """Pure-JAX reference matching the kernel's numerics (bf16 MXU operands,
    f32 accumulation, f32 tanh / BatchNorm)."""
    def mm(a, w):
        return jnp.dot(a.astype(jnp.bfloat16), w.astype(jnp.bfloat16),
                       preferred_element_type=jnp.float32)

    h = jnp.tanh(mm(x, params["w0"]) + params["b0"])
    h = jnp.tanh(mm(h, params["w1"]) + params["b1"])
    mu = mm(h, params["wmu"]) + params["bmu"]
    ls = mm(h, params["wsig"]) + params["bsig"]

    def bn(z):
        m = jnp.mean(z, axis=0, keepdims=True)
        v = jnp.mean((z - m) ** 2, axis=0, keepdims=True)
        return (z - m) / jnp.sqrt(v + 1e-5)

    return bn(mu), bn(ls)


if __name__ == "__main__":
    INPUT_SIZE = 32
    HIDDEN_SIZES = (64, 64)
    OUTPUT_SIZE = 16
    BATCH = 8

    key = jax.random.PRNGKey(0)
    kx, kp = jax.random.split(key)
    x = jax.random.normal(kx, (BATCH, INPUT_SIZE), jnp.float32)
    params = init_params(kp, INPUT_SIZE, HIDDEN_SIZES, OUTPUT_SIZE)

    forward = make_inference_network_forward(INPUT_SIZE, HIDDEN_SIZES, OUTPUT_SIZE)
    mu, log_sigma = forward(x, params["w_all"], params["b_all"])
    jax.block_until_ready((mu, log_sigma))

    mu_ref, ls_ref = reference_forward(x, params)
    assert mu.shape == (BATCH, OUTPUT_SIZE) and log_sigma.shape == (BATCH, OUTPUT_SIZE)
    assert jnp.allclose(mu, mu_ref, atol=1e-2, rtol=1e-2)
    assert jnp.allclose(log_sigma, ls_ref, atol=1e-2, rtol=1e-2)

    print("KERNEL_OK")
</pallas_src>

<mosaic_0001>
module attributes {stable_mosaic.version = 11 : i64} {
  func.func @_inference_kernel(%arg0: i32, %arg1: i32, %arg2: memref<16x128xbf16, #tpu.memory_space<vmem>>, %arg3: memref<3x128x128xbf16, #tpu.memory_space<vmem>>, %arg4: memref<3x128xf32, #tpu.memory_space<vmem>>, %arg5: memref<16x128xf32, #tpu.memory_space<vmem>>, %arg6: memref<1x128xf32, #tpu.memory_space<vmem>>, %arg7: memref<1x128xf32, #tpu.memory_space<vmem>>) attributes {dimension_semantics = [#tpu.dimension_semantics<arbitrary>, #tpu.dimension_semantics<arbitrary>], iteration_bounds = array<i64: 2, 1>, scalar_prefetch = 0 : i64, scratch_operands = 2 : i64, tpu.core_type = #tpu.core_type<tc>, window_params = [{transform_indices = @transform_0, window_bounds = array<i64: 16, 128>}, {pipeline_mode = #tpu.pipeline_mode<synchronous>, transform_indices = @transform_1, window_bounds = array<i64: 3, 128, 128>}, {pipeline_mode = #tpu.pipeline_mode<synchronous>, transform_indices = @transform_2, window_bounds = array<i64: 3, 128>}, {transform_indices = @transform_3, window_bounds = array<i64: 16, 128>}]} {
    %c0_i32 = arith.constant 0 : i32
    %0 = arith.cmpi eq, %arg0, %c0_i32 : i32
    %c0_i32_0 = arith.constant 0 : i32
    %1 = arith.cmpi eq, %arg1, %c0_i32_0 : i32
    %2 = arith.andi %0, %1 : i1
    %3 = arith.extui %2 : i1 to i32
    %c0_i32_1 = arith.constant 0 : i32
    %4 = arith.cmpi ne, %3, %c0_i32_1 : i32
    scf.if %4 {
      %cst_17 = arith.constant 0.000000e+00 : f32
      %43 = vector.broadcast %cst_17 : f32 to vector<1x128xf32>
      %c0_18 = arith.constant 0 : index
      %c0_19 = arith.constant 0 : index
      %44 = vector.load %arg6[%c0_18, %c0_19] : memref<1x128xf32, #tpu.memory_space<vmem>>, vector<1x128xf32>
      tpu.vector_store %arg6[%c0_18, %c0_19], %43 {strides = array<i32>} : memref<1x128xf32, #tpu.memory_space<vmem>>, vector<1x128xf32>,
      %cst_20 = arith.constant 0.000000e+00 : f32
      %45 = vector.broadcast %cst_20 : f32 to vector<1x128xf32>
      %c0_21 = arith.constant 0 : index
      %c0_22 = arith.constant 0 : index
      %46 = vector.load %arg7[%c0_21, %c0_22] : memref<1x128xf32, #tpu.memory_space<vmem>>, vector<1x128xf32>
      tpu.vector_store %arg7[%c0_21, %c0_22], %45 {strides = array<i32>} : memref<1x128xf32, #tpu.memory_space<vmem>>, vector<1x128xf32>,
    } else {
    }
    %c0 = arith.constant 0 : index
    %c0_2 = arith.constant 0 : index
    %5 = vector.load %arg2[%c0, %c0_2] : memref<16x128xbf16, #tpu.memory_space<vmem>>, vector<16x128xbf16>
    %c0_3 = arith.constant 0 : index
    %c0_4 = arith.constant 0 : index
    %6 = vector.load %arg4[%c0_3, %c0_4] : memref<3x128xf32, #tpu.memory_space<vmem>>, vector<3x128xf32>
    %c0_5 = arith.constant 0 : index
    %c0_6 = arith.constant 0 : index
    %c0_7 = arith.constant 0 : index
    %7 = vector.load %arg3[%c0_5, %c0_6, %c0_7] : memref<3x128x128xbf16, #tpu.memory_space<vmem>>, vector<1x128x128xbf16>
    %8 = vector.shape_cast %7 : vector<1x128x128xbf16> to vector<128x128xbf16>
    %cst = arith.constant dense<0.000000e+00> : vector<16x128xf32>
    %9 = tpu.matmul %5, %8, %cst {dimension_numbers = #tpu.dot_dimension_numbers<[1], [0], [0], [1], [0, 0, 1, 1], [], []>} : vector<16x128xbf16>, vector<128x128xbf16>, vector<16x128xf32> -> vector<16x128xf32>
    %10 = vector.extract_strided_slice %6 {offsets = [0, 0], sizes = [1, 128], strides = [1, 1]} : vector<3x128xf32> to vector<1x128xf32>
    %11 = vector.broadcast %10 : vector<1x128xf32> to vector<16x128xf32>
    %12 = arith.addf %9, %11 : vector<16x128xf32>
    %13 = math.tanh %12 : vector<16x128xf32>
    %14 = arith.truncf %13 : vector<16x128xf32> to vector<16x128xbf16>
    %c1 = arith.constant 1 : index
    %c0_8 = arith.constant 0 : index
    %c0_9 = arith.constant 0 : index
    %15 = vector.load %arg3[%c1, %c0_8, %c0_9] : memref<3x128x128xbf16, #tpu.memory_space<vmem>>, vector<1x128x128xbf16>
    %16 = vector.shape_cast %15 : vector<1x128x128xbf16> to vector<128x128xbf16>
    %cst_10 = arith.constant dense<0.000000e+00> : vector<16x128xf32>
    %17 = tpu.matmul %14, %16, %cst_10 {dimension_numbers = #tpu.dot_dimension_numbers<[1], [0], [0], [1], [0, 0, 1, 1], [], []>} : vector<16x128xbf16>, vector<128x128xbf16>, vector<16x128xf32> -> vector<16x128xf32>
    %18 = vector.extract_strided_slice %6 {offsets = [1, 0], sizes = [1, 128], strides = [1, 1]} : vector<3x128xf32> to vector<1x128xf32>
    %19 = vector.broadcast %18 : vector<1x128xf32> to vector<16x128xf32>
    %20 = arith.addf %17, %19 : vector<16x128xf32>
    %21 = math.tanh %20 : vector<16x128xf32>
    %22 = arith.truncf %21 : vector<16x128xf32> to vector<16x128xbf16>
    %c2 = arith.constant 2 : index
    %c0_11 = arith.constant 0 : index
    %c0_12 = arith.constant 0 : index
    %23 = vector.load %arg3[%c2, %c0_11, %c0_12] : memref<3x128x128xbf16, #tpu.memory_space<vmem>>, vector<1x128x128xbf16>
    %24 = vector.shape_cast %23 : vector<1x128x128xbf16> to vector<128x128xbf16>
    %cst_13 = arith.constant dense<0.000000e+00> : vector<16x128xf32>
    %25 = tpu.matmul %22, %24, %cst_13 {dimension_numbers = #tpu.dot_dimension_numbers<[1], [0], [0], [1], [0, 0, 1, 1], [], []>} : vector<16x128xbf16>, vector<128x128xbf16>, vector<16x128xf32> -> vector<16x128xf32>
    %26 = vector.extract_strided_slice %6 {offsets = [2, 0], sizes = [1, 128], strides = [1, 1]} : vector<3x128xf32> to vector<1x128xf32>
    %27 = vector.broadcast %26 : vector<1x128xf32> to vector<16x128xf32>
    %28 = arith.addf %25, %27 : vector<16x128xf32>
    %29 = tpu.iota {dimensions = array<i32: 0>} : vector<16x1xi32>
    %c16_i32 = arith.constant 16 : i32
    %30 = arith.muli %arg1, %c16_i32 : i32
    %31 = vector.broadcast %30 : i32 to vector<16x1xi32>
    %32 = arith.addi %29, %31 : vector<16x1xi32>
    %c8_i32 = arith.constant 8 : i32
    %33 = vector.broadcast %c8_i32 : i32 to vector<16x1xi32>
    %34 = arith.cmpi slt, %32, %33 : vector<16x1xi32>
    %35 = arith.extui %34 : vector<16x1xi1> to vector<16x1xi32>
    %36 = arith.sitofp %35 : vector<16x1xi32> to vector<16x1xf32>
    %c0_i32_14 = arith.constant 0 : i32
    %37 = arith.cmpi eq, %arg0, %c0_i32_14 : i32
    %38 = arith.extui %37 : i1 to i32
    %c0_i32_15 = arith.constant 0 : i32
    %39 = arith.cmpi ne, %38, %c0_i32_15 : i32
    scf.if %39 {
      %43 = vector.broadcast %36 : vector<16x1xf32> to vector<16x128xf32>
      %44 = arith.mulf %28, %43 : vector<16x128xf32>
      %c0_17 = arith.constant 0 : index
      %c0_18 = arith.constant 0 : index
      %45 = vector.load %arg6[%c0_17, %c0_18] : memref<1x128xf32, #tpu.memory_space<vmem>>, vector<1x128xf32>
      %cst_19 = arith.constant dense<0.000000e+00> : vector<128xf32>
      %46 = vector.multi_reduction <add>, %44, %cst_19 [0] : vector<16x128xf32> to vector<128xf32>
      %47 = vector.shape_cast %46 : vector<128xf32> to vector<1x128xf32>
      %48 = arith.addf %45, %47 : vector<1x128xf32>
      %c0_20 = arith.constant 0 : index
      %c0_21 = arith.constant 0 : index
      %49 = vector.load %arg6[%c0_20, %c0_21] : memref<1x128xf32, #tpu.memory_space<vmem>>, vector<1x128xf32>
      tpu.vector_store %arg6[%c0_20, %c0_21], %48 {strides = array<i32>} : memref<1x128xf32, #tpu.memory_space<vmem>>, vector<1x128xf32>,
      %c0_22 = arith.constant 0 : index
      %c0_23 = arith.constant 0 : index
      %50 = vector.load %arg7[%c0_22, %c0_23] : memref<1x128xf32, #tpu.memory_space<vmem>>, vector<1x128xf32>
      %51 = arith.mulf %44, %28 : vector<16x128xf32>
      %cst_24 = arith.constant dense<0.000000e+00> : vector<128xf32>
      %52 = vector.multi_reduction <add>, %51, %cst_24 [0] : vector<16x128xf32> to vector<128xf32>
      %53 = vector.shape_cast %52 : vector<128xf32> to vector<1x128xf32>
      %54 = arith.addf %50, %53 : vector<1x128xf32>
      %c0_25 = arith.constant 0 : index
      %c0_26 = arith.constant 0 : index
      %55 = vector.load %arg7[%c0_25, %c0_26] : memref<1x128xf32, #tpu.memory_space<vmem>>, vector<1x128xf32>
      tpu.vector_store %arg7[%c0_25, %c0_26], %54 {strides = array<i32>} : memref<1x128xf32, #tpu.memory_space<vmem>>, vector<1x128xf32>,
    } else {
    }
    %c1_i32 = arith.constant 1 : i32
    %40 = arith.cmpi eq, %arg0, %c1_i32 : i32
    %41 = arith.extui %40 : i1 to i32
    %c0_i32_16 = arith.constant 0 : i32
    %42 = arith.cmpi ne, %41, %c0_i32_16 : i32
    scf.if %42 {
      %c0_17 = arith.constant 0 : index
      %c0_18 = arith.constant 0 : index
      %43 = vector.load %arg6[%c0_17, %c0_18] : memref<1x128xf32, #tpu.memory_space<vmem>>, vector<1x128xf32>
      %cst_19 = arith.constant 1.250000e-01 : f32
      %44 = vector.broadcast %cst_19 : f32 to vector<1x128xf32>
      %45 = arith.mulf %43, %44 : vector<1x128xf32>
      %c0_20 = arith.constant 0 : index
      %c0_21 = arith.constant 0 : index
      %46 = vector.load %arg7[%c0_20, %c0_21] : memref<1x128xf32, #tpu.memory_space<vmem>>, vector<1x128xf32>
      %cst_22 = arith.constant 1.250000e-01 : f32
      %47 = vector.broadcast %cst_22 : f32 to vector<1x128xf32>
      %48 = arith.mulf %46, %47 : vector<1x128xf32>
      %49 = arith.mulf %45, %45 : vector<1x128xf32>
      %50 = arith.subf %48, %49 : vector<1x128xf32>
      %cst_23 = arith.constant 0.000000e+00 : f32
      %51 = vector.broadcast %cst_23 : f32 to vector<1x128xf32>
      %52 = arith.maximumf %50, %51 : vector<1x128xf32>
      %53 = vector.broadcast %45 : vector<1x128xf32> to vector<16x128xf32>
      %54 = arith.subf %28, %53 : vector<16x128xf32>
      %cst_24 = arith.constant 9.99999974E-6 : f32
      %55 = vector.broadcast %cst_24 : f32 to vector<1x128xf32>
      %56 = arith.addf %52, %55 : vector<1x128xf32>
      %57 = math.rsqrt %56 : vector<1x128xf32>
      %58 = vector.broadcast %57 : vector<1x128xf32> to vector<16x128xf32>
      %59 = arith.mulf %54, %58 : vector<16x128xf32>
      %c0_25 = arith.constant 0 : index
      %c0_26 = arith.constant 0 : index
      %60 = vector.load %arg5[%c0_25, %c0_26] : memref<16x128xf32, #tpu.memory_space<vmem>>, vector<16x128xf32>
      tpu.vector_store %arg5[%c0_25, %c0_26], %59 {strides = array<i32>} : memref<16x128xf32, #tpu.memory_space<vmem>>, vector<16x128xf32>,
    } else {
    }
    return
  }
  func.func @transform_0(%arg0: i32, %arg1: i32) -> (i32, i32) {
    %c0_i32 = arith.constant 0 : i32
    %c0_i32_0 = arith.constant 0 : i32
    return %arg1, %c0_i32 : i32, i32
  }
  func.func @transform_1(%arg0: i32, %arg1: i32) -> (i32, i32, i32) {
    %c0_i32 = arith.constant 0 : i32
    %c0_i32_0 = arith.constant 0 : i32
    %c0_i32_1 = arith.constant 0 : i32
    %c0_i32_2 = arith.constant 0 : i32
    return %c0_i32, %c0_i32_0, %c0_i32_1 : i32, i32, i32
  }
  func.func @transform_2(%arg0: i32, %arg1: i32) -> (i32, i32) {
    %c0_i32 = arith.constant 0 : i32
    %c0_i32_0 = arith.constant 0 : i32
    %c0_i32_1 = arith.constant 0 : i32
    return %c0_i32, %c0_i32_0 : i32, i32
  }
  func.func @transform_3(%arg0: i32, %arg1: i32) -> (i32, i32) {
    %0 = arith.muli %arg1, %arg0 : i32
    %c0_i32 = arith.constant 0 : i32
    %c0_i32_0 = arith.constant 0 : i32
    return %0, %c0_i32 : i32, i32
  }
}

</mosaic_0001>

<bundles_post_ra>
// kernel: forward.1
= control target key start
LH: loop header
LB: loop body
LE: loop exit
PB: predicated region body
PF: predicated region fallthrough
CT: control target
= control target key end

     0   :  { %8 = vsyncpa [#allocation5], 0  ;;  %s995_s12 = smov 0   ;;  %s997_s13 = smov 0   ;;  %s1096_s0 = inlined_call_operand.vmem [shape: bf16[16,128], index: 0, kind: input, shape index: {}]   ;;  %s1097_s1 = inlined_call_operand.hbm [shape: bf16[3,128,128], index: 1, kind: input, shape index: {}]   ;;  %s1098_s2 = inlined_call_operand.vmem [shape: f32[3,128], index: 2, kind: input, shape index: {}]   ;;  %s1099_s3 = inlined_call_operand.vmem [shape: f32[16,128], index: 3, kind: output, shape index: {}]  }
   0x1   :  { %s999_s14 = smov 0  }
   0x2 LB: > { %s713_s15 = sadd.s32 4294967295, %s967_s14   ;;  %s26_s16 = sadd.s32 1, %s963_s13  ;;  %s967_s14 = sphi %s999_s14, %s14_s14   ;;  %s963_s13 = sphi %s997_s13, %s1103_s13   ;;  %s959_s12 = sphi %s995_s12, %s1102_s12  }
   0x3   : > { %p28_p0 = scmp.ge.s32.totalorder %s26_s16, 2  ;;  %p715_p1 = scmp.ge.s32.totalorder %s967_s14, 1 }
   0x4   : > { %p127_p2 = scmp.lt.s32.totalorder %s967_s14, 3  ;;  %p1020_p4 = scmp.eq.s32.totalorder %s713_s15, 0 }
   0x5   : > { %s1105_s16 = smov (%p28_p0, %s26_s16), 0  ;;  %s969_s19 = smov [#allocation4]  }
   0x6   : > { %p1016_p3 = pnand %p715_p1, %p127_p2  ;;  %s148_s20 = sshll.u32 %s969_s19, 4  ;;  %s149_s20 = int_to_ptr.vmem [resolvable:$true] %s148_s20 }
   0x7   : > { %s926_s21 = scalar_lea.vmem %s149_s20, 3072  ;;  %p934_p11 = scmp.lt.s32.totalorder %s149_s20, %s149_s20 }
   0x8   : > { %p844_p5 = pneg %p1016_p3  ;;  %p927_p8 = scmp.ne.s32.totalorder %s149_s20, %s926_s21 }
   0x9   : > { %p935_p12 = scmp.lt.s32.totalorder %s926_s21, %s926_s21 }
   0xa   : > { %p845_p6 = pnand %p1020_p4, %p844_p5 }
   0xb   : > { %p936_p13 = por %p935_p12, %p934_p11 }
   0xc   : > { %p917_p7 = pneg %p845_p6 }
   0xe   : > { %p929_p9 = pnand %p927_p8, %p917_p7 }
  0x10   : > { %p930_p10 = pneg %p929_p9 }
  0x12   : > { %p937_p0 = pnand %p936_p13, %p930_p10 }
  0x14   : > { %940 = shalt.err (!%p937_p0)
}
  0x15   : > { %s970_s22 = smov 64   ;;  %s971_s23 = smov 4  }
  0x16   : > { %847 = dma.hbm_to_vmem [thread:$0]  (!%p845_p6), %s1097_s1, 3072, %s149_s20, [#allocation5], %s970_s22, %s970_s22, %s971_s23  }
  0x17   : > { %167 = sbr.rel (%p1016_p3) target bundleno = 756 (0x2f4), region = 32 }
  0x1c   : > { %954 = dma.done.wait (%p1020_p4), [#allocation5], 3072  }
  0x1d   : > { %956 = vsyncadd (%p1020_p4), [#allocation5], 4294964224  ;;  %p207_p1 = scmp.eq.s32.totalorder %s959_s12, 0 }
  0x1e   : > { %v972_v0 = vmov (%p207_p1), 0.0  }
  0x1f   : > { %212 = sbr.rel (!%p207_p1) target bundleno = 36 (0x24), region = 40  ;;  %213 = vst [vmem:[#allocation2] sm:$0x1] (%p207_p1), %v972_v0  ;;  %214 = vst [vmem:[#allocation3] sm:$0x1] (%p207_p1), %v972_v0 }
  0x24 PF: > { %v880_v1 = vld [vmem:[#allocation4 + $0x38] sm:$0xff]   ;;  %v973_v2 = vmov 0.0   ;;  %v881_v3 = vld [vmem:[#allocation4 + $0x30] sm:$0xff]   ;;  %vm974_vm0 = vmmov 0   ;;  %v882_v4 = vld [vmem:[#allocation4 + $0x28] sm:$0xff]   ;;  %v234_v21 = vlaneseq  ;;  %p746_p2 = scmp.ne.s32.totalorder %s959_s12, 0 }
  0x25   : > { %780 = vmatprep.subr.bf16.mxu0 %v973_v2  ;;  %800 = vmatprep.subr.bf16.mxu1 %v973_v2  ;;  %v889_v5 = vld [vmem:[#allocation4 + $0x78] sm:$0xff]   ;;  %v883_v6 = vld [vmem:[#allocation4 + $0x20] sm:$0xff]   ;;  %v890_v7 = vld [vmem:[#allocation4 + $0x70] sm:$0xff]  }
  0x26   : > { %781 = vmatpush3.bf16.msra.mxu0 %v880_v1  ;;  %796 = vmatprep.mubr.msk.bf16.mxu0 %vm974_vm0, %v973_v2  ;;  %v884_v8 = vld [vmem:[#allocation4 + $0x18] sm:$0xff]   ;;  %v885_v9 = vld [vmem:[#allocation4 + $0x10] sm:$0xff]   ;;  %v886_v10 = vld [vmem:[#allocation4 + $0x8] sm:$0xff]   ;;  %v235_v22 = vshrl.u32 %v234_v21, 7 }
  0x27   : > { %782 = vmatprep.subr.bf16.mxu0 %v973_v2  ;;  %816 = vmatprep.mubr.msk.bf16.mxu1 %vm974_vm0, %v973_v2  ;;  %v887_v11 = vld [vmem:[#allocation4] sm:$0xff]   ;;  %v891_v13 = vld [vmem:[#allocation4 + $0x68] sm:$0xff]   ;;  %v893_v15 = vld [vmem:[#allocation4 + $0x58] sm:$0xff]  }
  0x28   : > { %801 = vmatpush3.bf16.msra.mxu1 %v889_v5  ;;  %v888_v12 = vld [vmem:[%s1096_s0] sm:$0xff]   ;;  %v894_v16 = vld [vmem:[#allocation4 + $0x50] sm:$0xff]   ;;  %v895_v17 = vld [vmem:[#allocation4 + $0x48] sm:$0xff]   ;;  %v1066_v23 = vsub.s32 0, %v235_v22  ;;  %v355_v41 = vsub.s32 1, %v235_v22  ;;  %v468_v52 = vsub.s32 2, %v235_v22 }
  0x29   : > { %802 = vmatprep.subr.bf16.mxu1 %v973_v2  ;;  %v892_v14 = vld [vmem:[#allocation4 + $0x60] sm:$0xff]   ;;  %v897_v19 = vld [vmem:[#allocation4 + $0xb8] sm:$0xff]   ;;  %v898_v20 = vld [vmem:[#allocation4 + $0xb0] sm:$0xff]  }
  0x2a   : > { %783 = vmatpush3.bf16.msra.mxu0 %v881_v3  ;;  %v896_v18 = vld [vmem:[#allocation4 + $0x40] sm:$0xff]   ;;  %v899_v35 = vld [vmem:[#allocation4 + $0xa8] sm:$0xff]   ;;  %v901_v37 = vld [vmem:[#allocation4 + $0x98] sm:$0xff]  }
  0x2b   : > { %784 = vmatprep.subr.bf16.mxu0 %v973_v2  ;;  %v217_v24 = vld [vmem:[%s1098_s2] sm:$0x7]  ;;  %v902_v38 = vld [vmem:[#allocation4 + $0x90] sm:$0xff]   ;;  %v903_v39 = vld [vmem:[#allocation4 + $0x88] sm:$0xff]  }
  0x2c   : > { %803 = vmatpush3.bf16.msra.mxu1 %v890_v7  ;;  %v237_v25 = vrot.slane %v217_v24, %v1066_v23  ;;  %v900_v36 = vld [vmem:[#allocation4 + $0xa0] sm:$0xff]   ;;  %v356_v42 = vrot.slane %v217_v24, %v355_v41  ;;  %v469_v53 = vrot.slane %v217_v24, %v468_v52 }
  0x2d   : > { %804 = vmatprep.subr.bf16.mxu1 %v973_v2  ;;  %v904_v40 = vld [vmem:[#allocation4 + $0x80] sm:$0xff]  }
  0x2e   : > { %785 = vmatpush3.bf16.msra.mxu0 %v882_v4 }
  0x2f   : > { %786 = vmatprep.subr.bf16.mxu0 %v973_v2 }
  0x30   : > { %805 = vmatpush3.bf16.msra.mxu1 %v891_v13 }
  0x31   : > { %806 = vmatprep.subr.bf16.mxu1 %v973_v2 }
  0x32   : > { %787 = vmatpush3.bf16.msra.mxu0 %v883_v6 }
  0x33   : > { %788 = vmatprep.subr.bf16.mxu0 %v973_v2 }
  0x34   : > { %807 = vmatpush3.bf16.msra.mxu1 %v892_v14 }
  0x35   : > { %808 = vmatprep.subr.bf16.mxu1 %v973_v2 }
  0x36   : > { %789 = vmatpush3.bf16.msra.mxu0 %v884_v8 }
  0x37   : > { %790 = vmatprep.subr.bf16.mxu0 %v973_v2 }
  0x38   : > { %809 = vmatpush3.bf16.msra.mxu1 %v893_v15 }
  0x39   : > { %810 = vmatprep.subr.bf16.mxu1 %v973_v2 }
  0x3a   : > { %791 = vmatpush3.bf16.msra.mxu0 %v885_v9 }
  0x3b   : > { %792 = vmatprep.subr.bf16.mxu0 %v973_v2 }
  0x3c   : > { %811 = vmatpush3.bf16.msra.mxu1 %v894_v16 }
  0x3d   : > { %812 = vmatprep.subr.bf16.mxu1 %v973_v2 }
  0x3e   : > { %793 = vmatpush3.bf16.msra.mxu0 %v886_v10 }
  0x3f   : > { %794 = vmatprep.subr.bf16.mxu0 %v973_v2 }
  0x40   : > { %813 = vmatpush3.bf16.msra.mxu1 %v895_v17 }
  0x41   : > { %814 = vmatprep.subr.bf16.mxu1 %v973_v2 }
  0x42   : > { %795 = vmatpush3.bf16.msra.mxu0 %v887_v11 }
  0x43   : > { %820 = vmatprep.subr.bf16.mxu0 %v973_v2 }
  0x44   : > { %815 = vmatpush3.bf16.msra.mxu1 %v896_v18 }
  0x45   : > { %797 = vmatmul.mubr.bf16.vlgmr.msra.gmra.mxu0 %v888_v12 }
  0x46   : > { %836 = vmatprep.mubr.msk.bf16.mxu0 %vm974_vm0, %v973_v2  ;;  %821 = vmatpush3.bf16.msra.mxu0 %v897_v19 }
  0x47   : > { %822 = vmatprep.subr.bf16.mxu0 %v973_v2 }
  0x4a   : > { %823 = vmatpush3.bf16.msra.mxu0 %v898_v20 }
  0x4b   : > { %824 = vmatprep.subr.bf16.mxu0 %v973_v2 }
  0x4e   : > { %825 = vmatpush3.bf16.msra.mxu0 %v899_v35 }
  0x4f   : > { %826 = vmatprep.subr.bf16.mxu0 %v973_v2 }
  0x52   : > { %827 = vmatpush3.bf16.msra.mxu0 %v900_v36 }
  0x53   : > { %828 = vmatprep.subr.bf16.mxu0 %v973_v2 }
  0x56   : > { %829 = vmatpush3.bf16.msra.mxu0 %v901_v37 }
  0x57   : > { %830 = vmatprep.subr.bf16.mxu0 %v973_v2 }
  0x5a   : > { %831 = vmatpush3.bf16.msra.mxu0 %v902_v38 }
  0x5b   : > { %832 = vmatprep.subr.bf16.mxu0 %v973_v2 }
  0x5e   : > { %833 = vmatpush3.bf16.msra.mxu0 %v903_v39 }
  0x5f   : > { %834 = vmatprep.subr.bf16.mxu0 %v973_v2 }
  0x62   : > { %835 = vmatpush3.bf16.msra.mxu0 %v904_v40 }
 0x105   : > { %v326_v26 = vpop.f32.mrf.mxu0 }
 0x106   : > { %v327_v27 = vadd.f32 %v326_v26, %v237_v25 }
 0x107   : > { %v798_v28 = vpop.f32.mrf.mxu0 }
 0x108   : > { %905 = vtanh.f32 %v327_v27 }
 0x109   : > { %v329_v29 = vpop.f32.mrf.mxu0 }
 0x10a   : > { %v330_v30 = vadd.f32 %v329_v29, %v237_v25 }
 0x10b   : > { %v799_v31 = vpop.f32.mrf.mxu0 }
 0x10c   : > { %907 = vtanh.f32 %v330_v30 }
 0x115   : > { %v906_v32 = vpop.eup %905 }
 0x119   : > { %v908_v33 = vpop.eup %907 }
 0x11a   : > { %v335_v34 = vpack.c.bf16 %v908_v33, %v906_v32 }
 0x11c   : > { %817 = vmatmul.mubr.bf16.vlgmr.msra.gmra.mxu1 %v335_v34 }
 0x1dc   : > { %v439_v43 = vpop.f32.mrf.mxu1 }
 0x1dd   : > { %v440_v44 = vadd.f32 %v439_v43, %v356_v42 }
 0x1de   : > { %v818_v45 = vpop.f32.mrf.mxu1 }
 0x1df   : > { %909 = vtanh.f32 %v440_v44 }
 0x1e0   : > { %v442_v46 = vpop.f32.mrf.mxu1 }
 0x1e1   : > { %v443_v47 = vadd.f32 %v442_v46, %v356_v42 }
 0x1e2   : > { %v819_v48 = vpop.f32.mrf.mxu1 }
 0x1e3   : > { %911 = vtanh.f32 %v443_v47 }
 0x1ec   : > { %v910_v49 = vpop.eup %909 }
 0x1f0   : > { %v912_v50 = vpop.eup %911 }
 0x1f1   : > { %v448_v51 = vpack.c.bf16 %v912_v50, %v910_v49 }
 0x1f3   : > { %837 = vmatmul.mubr.bf16.vlgmr.msra.gmra.mxu0 %v448_v51 }
 0x2b3   : > { %v552_v54 = vpop.f32.mrf.mxu0 }
 0x2b4   : > { %v553_v55 = vadd.f32 %v552_v54, %v469_v53 }
 0x2b5   : > { %v838_v56 = vpop.f32.mrf.mxu0  ;;  %574 = sbr.rel (%p746_p2) target bundleno = 719 (0x2cf), region = 44 }
 0x2b7   : > { %v555_v57 = vpop.f32.mrf.mxu0 }
 0x2b8   : > { %v556_v58 = vadd.f32 %v555_v57, %v469_v53 }
 0x2b9   : > { %v839_v59 = vpop.f32.mrf.mxu0 }
 0x2ba   : > { %v576_v60 = vmul.f32 0.0, %v556_v58  ;;  %v588_v61 = vmul.f32 %v553_v55, %v553_v55  ;;  %v577_v10 = vld [vmem:[#allocation2] sm:$0x1]  ;;  %v587_v13 = vld [vmem:[#allocation3] sm:$0x1] }
 0x2bc   : > { %v578_v62 = vadd.f32 %v576_v60, %v553_v55  ;;  %v589_v63 = vmul.f32 %v576_v60, %v556_v58 }
 0x2be   : > { %v579_v0 = vrot.slane %v578_v62, 4  ;;  %v590_v1 = vadd.f32 %v589_v63, %v588_v61 }
 0x2c0   : > { %v580_v2 = vadd.f32 %v579_v0, %v578_v62  ;;  %v591_v3 = vrot.slane %v590_v1, 4 }
 0x2c2   : > { %v581_v4 = vrot.slane %v580_v2, 2  ;;  %v592_v5 = vadd.f32 %v591_v3, %v590_v1 }
 0x2c4   : > { %v582_v6 = vadd.f32 %v581_v4, %v580_v2  ;;  %v593_v7 = vrot.slane %v592_v5, 2 }
 0x2c6   : > { %v583_v8 = vrot.slane %v582_v6, 1  ;;  %v594_v9 = vadd.f32 %v593_v7, %v592_v5 }
 0x2c8   : > { %v584_v11 = vadd.f32 %v583_v8, %v582_v6  ;;  %v595_v12 = vrot.slane %v594_v9, 1 }
 0x2ca   : > { %v585_v14 = vadd.f32 %v584_v11, %v577_v10  ;;  %v596_v15 = vadd.f32 %v595_v12, %v594_v9 }
 0x2cc   : > { %586 = vst [vmem:[#allocation2] sm:$0x1] %v585_v14  ;;  %v597_v16 = vadd.f32 %v596_v15, %v587_v13 }
 0x2ce   : > { %598 = vst [vmem:[#allocation3] sm:$0x1] %v597_v16 }
 0x2cf PF: > { %p747_p3 = scmp.ne.s32.totalorder %s959_s12, 1 }
 0x2d1   : > { %602 = sbr.rel (%p747_p3) target bundleno = 756 (0x2f4), region = 48 }
 0x2d6   : > { %v603_v17 = vld [vmem:[#allocation2] sm:$0x1]  ;;  %v605_v18 = vld [vmem:[#allocation3] sm:$0x1] }
 0x2d7   : > { %v604_v19 = vmul.f32 0.125, %v603_v17  ;;  %v606_v20 = vmul.f32 0.125, %v605_v18 }
 0x2d9   : > { %v607_v21 = vmul.f32 %v604_v19, %v604_v19  ;;  %v614_v26 = vrot.slane %v604_v19, %v1066_v23 }
 0x2db   : > { %v608_v22 = vsub.f32 %v606_v20, %v607_v21  ;;  %v616_v27 = vsub.f32 %v553_v55, %v614_v26  ;;  %v617_v28 = vsub.f32 %v556_v58, %v614_v26 }
 0x2dd   : > { %v609_v24 = vmax.f32 %v608_v22, 0.0 }
 0x2df   : > { %v618_v25 = vadd.f32 1e-05, %v609_v24 }
 0x2e1   : > { %913 = vrsqrt.f32 %v618_v25 }
 0x2ee   : > { %v914_v29 = vpop.eup %913 }
 0x2ef   : > { %v624_v30 = vrot.slane %v914_v29, %v1066_v23 }
 0x2f1   : > { %v626_v31 = vmul.f32 %v624_v30, %v616_v27  ;;  %v627_v32 = vmul.f32 %v624_v30, %v617_v28 }
 0x2f3   : > { %628 = vst [vmem:[%s1099_s3] sm:$0xff] %v626_v31  ;;  %629 = vst [vmem:[%s1099_s3 + $0x8] sm:$0xff] %v627_v32 }
 0x2f4 PF: > { %s14_s14 = sadd.s32 1, %s967_s14   ;;  %s1102_s12 = smov %s963_s13 }
 0x2f5   : > { %p11_p4 = scmp.ge.s32.totalorder %s14_s14, 4   ;;  %s1103_s13 = smov %s1105_s16 }
 0x2f7   :  { %13 = sbr.rel (!%p11_p4) target bundleno = 2 (0x2), region = 81 }
 0x2fc   :  { %655 = vsyncpa [#allocation5], 1 }
 0x2fd   :  { %657 = vsyncpa [#allocation5 + $0x1], 1 }

</bundles_post_ra>
